<compile_context>
chip_gen: v6e
topology: v6e:2x2x1
jax: 0.10.0
libtpu: 0.0.40
codegen_flags: <defaults>
</compile_context>

<pallas_src>
import functools

import jax
import jax.numpy as jnp
from jax import lax
from jax.experimental import pallas as pl
from jax.experimental.pallas import tpu as pltpu


def _residual_block_b_kernel(x_ref,
                             w1_ref, b1_ref, g1_ref, be1_ref,
                             w2_ref, b2_ref, g2_ref, be2_ref,
                             o_ref, xh_ref, hh_ref,
                             *, TL, C, Cp, K, d1, d2, eps,
                             compute_dtype, carry_halo):
    t = pl.program_id(1)
    pad1 = (K - 1) * d1
    pad2 = (K - 1) * d2

    # Causal left-pad: at the first sequence tile of each batch element the
    # halo is all zeros.  (Scratch persists across grid steps, so this also
    # resets state when moving to the next batch element.)
    @pl.when(t == 0)
    def _():
        xh_ref[...] = jnp.zeros_like(xh_ref)
        hh_ref[...] = jnp.zeros_like(hh_ref)

    x = x_ref[0].astype(jnp.float32)                      # (TL, Cp)

    inv_c = 1.0 / C
    if Cp != C:
        ch_mask = lax.broadcasted_iota(jnp.int32, (1, Cp), 1) < C
    else:
        ch_mask = None

    def causal_conv(inp_ext, w_ref, b_ref, dil):
        # inp_ext: (pad + TL, Cp) with the halo rows at the top.
        taps = [inp_ext[k * dil:k * dil + TL, :] for k in range(K)]
        u = jnp.concatenate(taps, axis=1).astype(compute_dtype)   # (TL, K*Cp)
        acc = jnp.dot(u, w_ref[...], preferred_element_type=jnp.float32)
        return acc + b_ref[...]

    def ln_relu(acc, g_ref, be_ref):
        # LayerNorm over the real C channels only (padded channels are 0 and
        # get masked out of the statistics; gamma/beta padding keeps them 0).
        mean = jnp.sum(acc, axis=-1, keepdims=True) * inv_c
        diff = acc - mean
        if ch_mask is not None:
            diff = jnp.where(ch_mask, diff, 0.0)
        var = jnp.sum(diff * diff, axis=-1, keepdims=True) * inv_c
        out = diff * lax.rsqrt(var + eps) * g_ref[...] + be_ref[...]
        return jnp.maximum(out, 0.0)

    # ---- conv1 (dilation d1) + LN1 + ReLU
    x_ext = jnp.concatenate([xh_ref[...], x], axis=0)      # (pad1 + TL, Cp)
    h = ln_relu(causal_conv(x_ext, w1_ref, b1_ref, d1), g1_ref, be1_ref)

    # ---- conv2 (dilation d2 = 2*d1) + LN2 + ReLU
    h_ext = jnp.concatenate([hh_ref[...], h], axis=0)      # (pad2 + TL, Cp)
    out2 = ln_relu(causal_conv(h_ext, w2_ref, b2_ref, d2), g2_ref, be2_ref)

    # ---- residual add (padded channels are exactly 0 on both sides)
    o_ref[0] = (out2 + x).astype(o_ref.dtype)

    # Carry the halo (last pad rows of this tile) for the next sequence tile.
    if carry_halo:
        xh_ref[...] = x[TL - pad1:, :]
        hh_ref[...] = h[TL - pad2:, :]


def residual_block_b(x, params, *, kernel_size=3, dilation=1, eps=1e-8,
                     compute_dtype=jnp.bfloat16, seq_tile=256):
    """Forward pass of ResidualBlock_b.  x: (B, L, C) float32."""
    B, L, C = x.shape
    K, d1 = kernel_size, dilation
    d2 = dilation * 2
    pad1, pad2 = (K - 1) * d1, (K - 1) * d2
    w1, b1, g1, be1, w2, b2, g2, be2 = params

    # ---- lane-pad channels to a multiple of 128 (no-op if already aligned)
    Cp = ((C + 127) // 128) * 128
    cpad = Cp - C
    xp = jnp.pad(x, ((0, 0), (0, 0), (0, cpad))) if cpad else x

    def prep_w(w):  # (K, C, C) -> (K*Cp, Cp), taps folded into contraction dim
        wp = jnp.pad(w, ((0, 0), (0, cpad), (0, cpad))) if cpad else w
        return wp.reshape(K * Cp, Cp).astype(compute_dtype)

    def prep_v(v):  # (C,) -> (1, Cp) f32
        vp = jnp.pad(v, ((0, cpad),)) if cpad else v
        return vp.reshape(1, Cp).astype(jnp.float32)

    # ---- choose a sequence tile (bounds VMEM; halo carried across tiles)
    if (seq_tile < L and L % seq_tile == 0 and seq_tile % 8 == 0
            and seq_tile >= max(pad1, pad2, 8)):
        TL = seq_tile
    else:
        TL = L
    NT = L // TL
    carry_halo = NT > 1
    if carry_halo:
        assert TL >= pad1 and TL >= pad2, "sequence tile smaller than halo"

    kernel = functools.partial(
        _residual_block_b_kernel,
        TL=TL, C=C, Cp=Cp, K=K, d1=d1, d2=d2, eps=eps,
        compute_dtype=compute_dtype, carry_halo=carry_halo)

    grid_spec = pltpu.PrefetchScalarGridSpec(
        num_scalar_prefetch=0,
        grid=(B, NT),
        in_specs=[
            pl.BlockSpec((1, TL, Cp), lambda b, t: (b, t, 0)),   # x
            pl.BlockSpec((K * Cp, Cp), lambda b, t: (0, 0)),     # w1 (unfolded)
            pl.BlockSpec((1, Cp), lambda b, t: (0, 0)),          # b1
            pl.BlockSpec((1, Cp), lambda b, t: (0, 0)),          # ln1 gamma
            pl.BlockSpec((1, Cp), lambda b, t: (0, 0)),          # ln1 beta
            pl.BlockSpec((K * Cp, Cp), lambda b, t: (0, 0)),     # w2 (unfolded)
            pl.BlockSpec((1, Cp), lambda b, t: (0, 0)),          # b2
            pl.BlockSpec((1, Cp), lambda b, t: (0, 0)),          # ln2 gamma
            pl.BlockSpec((1, Cp), lambda b, t: (0, 0)),          # ln2 beta
        ],
        out_specs=pl.BlockSpec((1, TL, Cp), lambda b, t: (b, t, 0)),
        scratch_shapes=[pltpu.VMEM((pad1, Cp), jnp.float32),     # x halo carry
                        pltpu.VMEM((pad2, Cp), jnp.float32)],    # h halo carry
    )

    out_p = pl.pallas_call(
        kernel,
        out_shape=jax.ShapeDtypeStruct((B, L, Cp), x.dtype),
        grid_spec=grid_spec,
        compiler_params=pltpu.CompilerParams(
            dimension_semantics=("parallel", "arbitrary")),
    )(xp, prep_w(w1), prep_v(b1), prep_v(g1), prep_v(be1),
      prep_w(w2), prep_v(b2), prep_v(g2), prep_v(be2))

    return out_p[..., :C] if cpad else out_p


# ---------------------- pure-JAX reference (for verification) ---------------
def _ref_forward(x, params, *, K, dilation, eps=1e-8):
    w1, b1, g1, be1, w2, b2, g2, be2 = params
    B, L, C = x.shape

    def causal_conv(inp, w, b, dil):
        pad = (K - 1) * dil
        ip = jnp.pad(inp, ((0, 0), (pad, 0), (0, 0)))
        out = jnp.zeros((B, L, w.shape[-1]), jnp.float32) + b
        for k in range(K):
            out = out + jnp.einsum('blc,co->blo', ip[:, k * dil:k * dil + L, :],
                                   w[k], precision=jax.lax.Precision.HIGHEST)
        return out

    def ln(h, g, be):
        m = h.mean(-1, keepdims=True)
        v = ((h - m) ** 2).mean(-1, keepdims=True)
        return (h - m) / jnp.sqrt(v + eps) * g + be

    h = jax.nn.relu(ln(causal_conv(x, w1, b1, dilation), g1, be1))
    h2 = jax.nn.relu(ln(causal_conv(h, w2, b2, 2 * dilation), g2, be2))
    return h2 + x


if __name__ == "__main__":
    B, L, C = 2, 32, 8            # small shapes; L tiled into 2 tiles of 16
    K, dilation = 3, 1

    key = jax.random.PRNGKey(0)
    ks = jax.random.split(key, 9)
    x = jax.random.normal(ks[0], (B, L, C), jnp.float32)

    # Deterministic synthetic parameters (shapes from nn.Conv2d / nn.LayerNorm).
    w1 = 0.1 * jax.random.normal(ks[1], (K, C, C), jnp.float32)   # conv1.weight
    b1 = 0.1 * jax.random.normal(ks[2], (C,), jnp.float32)        # conv1.bias
    g1 = 1.0 + 0.1 * jax.random.normal(ks[3], (C,), jnp.float32)  # ln1.weight
    be1 = 0.1 * jax.random.normal(ks[4], (C,), jnp.float32)       # ln1.bias
    w2 = 0.1 * jax.random.normal(ks[5], (K, C, C), jnp.float32)   # conv2.weight
    b2 = 0.1 * jax.random.normal(ks[6], (C,), jnp.float32)        # conv2.bias
    g2 = 1.0 + 0.1 * jax.random.normal(ks[7], (C,), jnp.float32)  # ln2.weight
    be2 = 0.1 * jax.random.normal(ks[8], (C,), jnp.float32)       # ln2.bias
    params = (w1, b1, g1, be1, w2, b2, g2, be2)

    ref = _ref_forward(x, params, K=K, dilation=dilation)

    # f32-operand path: tight check of the structure (tiling, halo carry,
    # masked LayerNorm over padded channels, causal conv mapping).
    out_f32 = residual_block_b(x, params, kernel_size=K, dilation=dilation,
                               compute_dtype=jnp.float32, seq_tile=16)
    out_f32 = jax.block_until_ready(out_f32)
    assert out_f32.shape == (B, L, C)
    err_f32 = float(jnp.max(jnp.abs(out_f32 - ref)))
    assert err_f32 < 1e-3, f"f32 max abs err = {err_f32}"

    # bf16 MXU-operand path (production config): looser tolerance, the two
    # LayerNorms amplify bf16 rounding of the matmul operands.
    out_bf16 = residual_block_b(x, params, kernel_size=K, dilation=dilation,
                                compute_dtype=jnp.bfloat16, seq_tile=16)
    out_bf16 = jax.block_until_ready(out_bf16)
    err_max = float(jnp.max(jnp.abs(out_bf16 - ref)))
    err_mean = float(jnp.mean(jnp.abs(out_bf16 - ref)))
    assert err_max < 0.25 and err_mean < 2e-2, \
        f"bf16 max abs err = {err_max}, mean abs err = {err_mean}"

    print("KERNEL_OK")
</pallas_src>

<mosaic_0001>
module attributes {stable_mosaic.version = 11 : i64} {
  func.func @_residual_block_b_kernel(%arg0: i32, %arg1: i32, %arg2: memref<1x16x128xf32, #tpu.memory_space<vmem>>, %arg3: memref<384x128xf32, #tpu.memory_space<vmem>>, %arg4: memref<1x128xf32, #tpu.memory_space<vmem>>, %arg5: memref<1x128xf32, #tpu.memory_space<vmem>>, %arg6: memref<1x128xf32, #tpu.memory_space<vmem>>, %arg7: memref<384x128xf32, #tpu.memory_space<vmem>>, %arg8: memref<1x128xf32, #tpu.memory_space<vmem>>, %arg9: memref<1x128xf32, #tpu.memory_space<vmem>>, %arg10: memref<1x128xf32, #tpu.memory_space<vmem>>, %arg11: memref<1x16x128xf32, #tpu.memory_space<vmem>>, %arg12: memref<2x128xf32, #tpu.memory_space<vmem>>, %arg13: memref<4x128xf32, #tpu.memory_space<vmem>>) attributes {dimension_semantics = [#tpu.dimension_semantics<parallel>, #tpu.dimension_semantics<arbitrary>], iteration_bounds = array<i64: 2, 2>, scalar_prefetch = 0 : i64, scratch_operands = 2 : i64, tpu.core_type = #tpu.core_type<tc>, window_params = [{transform_indices = @transform_0, window_bounds = array<i64: 1, 16, 128>}, {pipeline_mode = #tpu.pipeline_mode<synchronous>, transform_indices = @transform_1, window_bounds = array<i64: 384, 128>}, {pipeline_mode = #tpu.pipeline_mode<synchronous>, transform_indices = @transform_2, window_bounds = array<i64: 1, 128>}, {pipeline_mode = #tpu.pipeline_mode<synchronous>, transform_indices = @transform_3, window_bounds = array<i64: 1, 128>}, {pipeline_mode = #tpu.pipeline_mode<synchronous>, transform_indices = @transform_4, window_bounds = array<i64: 1, 128>}, {pipeline_mode = #tpu.pipeline_mode<synchronous>, transform_indices = @transform_5, window_bounds = array<i64: 384, 128>}, {pipeline_mode = #tpu.pipeline_mode<synchronous>, transform_indices = @transform_6, window_bounds = array<i64: 1, 128>}, {pipeline_mode = #tpu.pipeline_mode<synchronous>, transform_indices = @transform_7, window_bounds = array<i64: 1, 128>}, {pipeline_mode = #tpu.pipeline_mode<synchronous>, transform_indices = @transform_8, window_bounds = array<i64: 1, 128>}, {transform_indices = @transform_9, window_bounds = array<i64: 1, 16, 128>}]} {
    %c0_i32 = arith.constant 0 : i32
    %0 = arith.cmpi eq, %arg1, %c0_i32 : i32
    %1 = arith.extui %0 : i1 to i32
    %c0_i32_0 = arith.constant 0 : i32
    %2 = arith.cmpi ne, %1, %c0_i32_0 : i32
    scf.if %2 {
      %cst_45 = arith.constant 0.000000e+00 : f32
      %94 = vector.broadcast %cst_45 : f32 to vector<2x128xf32>
      %c0_46 = arith.constant 0 : index
      %c0_47 = arith.constant 0 : index
      %95 = vector.load %arg12[%c0_46, %c0_47] : memref<2x128xf32, #tpu.memory_space<vmem>>, vector<2x128xf32>
      tpu.vector_store %arg12[%c0_46, %c0_47], %94 {strides = array<i32>} : memref<2x128xf32, #tpu.memory_space<vmem>>, vector<2x128xf32>,
      %cst_48 = arith.constant 0.000000e+00 : f32
      %96 = vector.broadcast %cst_48 : f32 to vector<4x128xf32>
      %c0_49 = arith.constant 0 : index
      %c0_50 = arith.constant 0 : index
      %97 = vector.load %arg13[%c0_49, %c0_50] : memref<4x128xf32, #tpu.memory_space<vmem>>, vector<4x128xf32>
      tpu.vector_store %arg13[%c0_49, %c0_50], %96 {strides = array<i32>} : memref<4x128xf32, #tpu.memory_space<vmem>>, vector<4x128xf32>,
    } else {
    }
    %c0 = arith.constant 0 : index
    %c0_1 = arith.constant 0 : index
    %c0_2 = arith.constant 0 : index
    %3 = vector.load %arg2[%c0, %c0_1, %c0_2] : memref<1x16x128xf32, #tpu.memory_space<vmem>>, vector<1x16x128xf32>
    %4 = vector.shape_cast %3 : vector<1x16x128xf32> to vector<16x128xf32>
    %5 = tpu.iota {dimensions = array<i32: 1>} : vector<1x128xi32>
    %c8_i32 = arith.constant 8 : i32
    %6 = vector.broadcast %c8_i32 : i32 to vector<1x128xi32>
    %7 = arith.cmpi slt, %5, %6 : vector<1x128xi32>
    %c0_3 = arith.constant 0 : index
    %c0_4 = arith.constant 0 : index
    %8 = vector.load %arg12[%c0_3, %c0_4] : memref<2x128xf32, #tpu.memory_space<vmem>>, vector<2x128xf32>
    %9 = tpu.concatenate %8, %4 in 0 : vector<2x128xf32>, vector<16x128xf32> -> vector<18x128xf32>
    %10 = vector.extract_strided_slice %9 {offsets = [0, 0], sizes = [16, 128], strides = [1, 1]} : vector<18x128xf32> to vector<16x128xf32>
    %11 = vector.extract_strided_slice %9 {offsets = [1, 0], sizes = [16, 128], strides = [1, 1]} : vector<18x128xf32> to vector<16x128xf32>
    %12 = vector.extract_strided_slice %9 {offsets = [2, 0], sizes = [16, 128], strides = [1, 1]} : vector<18x128xf32> to vector<16x128xf32>
    %13 = tpu.concatenate %10, %11, %12 in 1 : vector<16x128xf32>, vector<16x128xf32>, vector<16x128xf32> -> vector<16x384xf32>
    %c0_5 = arith.constant 0 : index
    %c0_6 = arith.constant 0 : index
    %14 = vector.load %arg3[%c0_5, %c0_6] : memref<384x128xf32, #tpu.memory_space<vmem>>, vector<384x128xf32>
    %cst = arith.constant dense<0.000000e+00> : vector<16x128xf32>
    %15 = tpu.matmul %13, %14, %cst {dimension_numbers = #tpu.dot_dimension_numbers<[1], [0], [0], [1], [0, 0, 1, 1], [], []>} : vector<16x384xf32>, vector<384x128xf32>, vector<16x128xf32> -> vector<16x128xf32>
    %c0_7 = arith.constant 0 : index
    %c0_8 = arith.constant 0 : index
    %16 = vector.load %arg4[%c0_7, %c0_8] : memref<1x128xf32, #tpu.memory_space<vmem>>, vector<1x128xf32>
    %17 = vector.broadcast %16 : vector<1x128xf32> to vector<16x128xf32>
    %18 = arith.addf %15, %17 : vector<16x128xf32>
    %cst_9 = arith.constant dense<0.000000e+00> : vector<16xf32>
    %19 = vector.multi_reduction <add>, %18, %cst_9 [1] : vector<16x128xf32> to vector<16xf32>
    %20 = vector.shape_cast %19 : vector<16xf32> to vector<16x1xf32>
    %cst_10 = arith.constant 1.250000e-01 : f32
    %21 = vector.broadcast %cst_10 : f32 to vector<16x1xf32>
    %22 = arith.mulf %20, %21 : vector<16x1xf32>
    %23 = vector.broadcast %22 : vector<16x1xf32> to vector<16x128xf32>
    %24 = arith.subf %18, %23 : vector<16x128xf32>
    %cst_11 = arith.constant 0.000000e+00 : f32
    %25 = vector.shape_cast %7 : vector<1x128xi1> to vector<1x128xi1>
    %26 = vector.broadcast %25 : vector<1x128xi1> to vector<16x128xi1>
    %27 = vector.broadcast %cst_11 : f32 to vector<16x128xf32>
    %28 = arith.select %26, %24, %27 : vector<16x128xi1>, vector<16x128xf32>
    %29 = arith.mulf %28, %28 : vector<16x128xf32>
    %cst_12 = arith.constant dense<0.000000e+00> : vector<16xf32>
    %30 = vector.multi_reduction <add>, %29, %cst_12 [1] : vector<16x128xf32> to vector<16xf32>
    %31 = vector.shape_cast %30 : vector<16xf32> to vector<16x1xf32>
    %cst_13 = arith.constant 1.250000e-01 : f32
    %32 = vector.broadcast %cst_13 : f32 to vector<16x1xf32>
    %33 = arith.mulf %31, %32 : vector<16x1xf32>
    %cst_14 = arith.constant 9.99999993E-9 : f32
    %34 = vector.broadcast %cst_14 : f32 to vector<16x1xf32>
    %35 = arith.addf %33, %34 : vector<16x1xf32>
    %36 = math.rsqrt %35 : vector<16x1xf32>
    %37 = vector.broadcast %36 : vector<16x1xf32> to vector<16x128xf32>
    %38 = arith.mulf %28, %37 : vector<16x128xf32>
    %c0_15 = arith.constant 0 : index
    %c0_16 = arith.constant 0 : index
    %39 = vector.load %arg5[%c0_15, %c0_16] : memref<1x128xf32, #tpu.memory_space<vmem>>, vector<1x128xf32>
    %40 = vector.broadcast %39 : vector<1x128xf32> to vector<16x128xf32>
    %41 = arith.mulf %38, %40 : vector<16x128xf32>
    %c0_17 = arith.constant 0 : index
    %c0_18 = arith.constant 0 : index
    %42 = vector.load %arg6[%c0_17, %c0_18] : memref<1x128xf32, #tpu.memory_space<vmem>>, vector<1x128xf32>
    %43 = vector.broadcast %42 : vector<1x128xf32> to vector<16x128xf32>
    %44 = arith.addf %41, %43 : vector<16x128xf32>
    %cst_19 = arith.constant 0.000000e+00 : f32
    %45 = vector.broadcast %cst_19 : f32 to vector<16x128xf32>
    %46 = arith.maximumf %44, %45 : vector<16x128xf32>
    %c0_20 = arith.constant 0 : index
    %c0_21 = arith.constant 0 : index
    %47 = vector.load %arg13[%c0_20, %c0_21] : memref<4x128xf32, #tpu.memory_space<vmem>>, vector<4x128xf32>
    %48 = tpu.concatenate %47, %46 in 0 : vector<4x128xf32>, vector<16x128xf32> -> vector<20x128xf32>
    %49 = vector.extract_strided_slice %48 {offsets = [0, 0], sizes = [16, 128], strides = [1, 1]} : vector<20x128xf32> to vector<16x128xf32>
    %50 = vector.extract_strided_slice %48 {offsets = [2, 0], sizes = [16, 128], strides = [1, 1]} : vector<20x128xf32> to vector<16x128xf32>
    %51 = vector.extract_strided_slice %48 {offsets = [4, 0], sizes = [16, 128], strides = [1, 1]} : vector<20x128xf32> to vector<16x128xf32>
    %52 = tpu.concatenate %49, %50, %51 in 1 : vector<16x128xf32>, vector<16x128xf32>, vector<16x128xf32> -> vector<16x384xf32>
    %c0_22 = arith.constant 0 : index
    %c0_23 = arith.constant 0 : index
    %53 = vector.load %arg7[%c0_22, %c0_23] : memref<384x128xf32, #tpu.memory_space<vmem>>, vector<384x128xf32>
    %cst_24 = arith.constant dense<0.000000e+00> : vector<16x128xf32>
    %54 = tpu.matmul %52, %53, %cst_24 {dimension_numbers = #tpu.dot_dimension_numbers<[1], [0], [0], [1], [0, 0, 1, 1], [], []>} : vector<16x384xf32>, vector<384x128xf32>, vector<16x128xf32> -> vector<16x128xf32>
    %c0_25 = arith.constant 0 : index
    %c0_26 = arith.constant 0 : index
    %55 = vector.load %arg8[%c0_25, %c0_26] : memref<1x128xf32, #tpu.memory_space<vmem>>, vector<1x128xf32>
    %56 = vector.broadcast %55 : vector<1x128xf32> to vector<16x128xf32>
    %57 = arith.addf %54, %56 : vector<16x128xf32>
    %cst_27 = arith.constant dense<0.000000e+00> : vector<16xf32>
    %58 = vector.multi_reduction <add>, %57, %cst_27 [1] : vector<16x128xf32> to vector<16xf32>
    %59 = vector.shape_cast %58 : vector<16xf32> to vector<16x1xf32>
    %cst_28 = arith.constant 1.250000e-01 : f32
    %60 = vector.broadcast %cst_28 : f32 to vector<16x1xf32>
    %61 = arith.mulf %59, %60 : vector<16x1xf32>
    %62 = vector.broadcast %61 : vector<16x1xf32> to vector<16x128xf32>
    %63 = arith.subf %57, %62 : vector<16x128xf32>
    %cst_29 = arith.constant 0.000000e+00 : f32
    %64 = vector.shape_cast %7 : vector<1x128xi1> to vector<1x128xi1>
    %65 = vector.broadcast %64 : vector<1x128xi1> to vector<16x128xi1>
    %66 = vector.broadcast %cst_29 : f32 to vector<16x128xf32>
    %67 = arith.select %65, %63, %66 : vector<16x128xi1>, vector<16x128xf32>
    %68 = arith.mulf %67, %67 : vector<16x128xf32>
    %cst_30 = arith.constant dense<0.000000e+00> : vector<16xf32>
    %69 = vector.multi_reduction <add>, %68, %cst_30 [1] : vector<16x128xf32> to vector<16xf32>
    %70 = vector.shape_cast %69 : vector<16xf32> to vector<16x1xf32>
    %cst_31 = arith.constant 1.250000e-01 : f32
    %71 = vector.broadcast %cst_31 : f32 to vector<16x1xf32>
    %72 = arith.mulf %70, %71 : vector<16x1xf32>
    %cst_32 = arith.constant 9.99999993E-9 : f32
    %73 = vector.broadcast %cst_32 : f32 to vector<16x1xf32>
    %74 = arith.addf %72, %73 : vector<16x1xf32>
    %75 = math.rsqrt %74 : vector<16x1xf32>
    %76 = vector.broadcast %75 : vector<16x1xf32> to vector<16x128xf32>
    %77 = arith.mulf %67, %76 : vector<16x128xf32>
    %c0_33 = arith.constant 0 : index
    %c0_34 = arith.constant 0 : index
    %78 = vector.load %arg9[%c0_33, %c0_34] : memref<1x128xf32, #tpu.memory_space<vmem>>, vector<1x128xf32>
    %79 = vector.broadcast %78 : vector<1x128xf32> to vector<16x128xf32>
    %80 = arith.mulf %77, %79 : vector<16x128xf32>
    %c0_35 = arith.constant 0 : index
    %c0_36 = arith.constant 0 : index
    %81 = vector.load %arg10[%c0_35, %c0_36] : memref<1x128xf32, #tpu.memory_space<vmem>>, vector<1x128xf32>
    %82 = vector.broadcast %81 : vector<1x128xf32> to vector<16x128xf32>
    %83 = arith.addf %80, %82 : vector<16x128xf32>
    %cst_37 = arith.constant 0.000000e+00 : f32
    %84 = vector.broadcast %cst_37 : f32 to vector<16x128xf32>
    %85 = arith.maximumf %83, %84 : vector<16x128xf32>
    %86 = arith.addf %85, %4 : vector<16x128xf32>
    %c0_38 = arith.constant 0 : index
    %c0_39 = arith.constant 0 : index
    %c0_40 = arith.constant 0 : index
    %87 = vector.load %arg11[%c0_38, %c0_39, %c0_40] : memref<1x16x128xf32, #tpu.memory_space<vmem>>, vector<1x16x128xf32>
    %88 = vector.shape_cast %87 : vector<1x16x128xf32> to vector<16x128xf32>
    %89 = vector.shape_cast %86 : vector<16x128xf32> to vector<1x16x128xf32>
    tpu.vector_store %arg11[%c0_38, %c0_39, %c0_40], %89 {strides = array<i32>} : memref<1x16x128xf32, #tpu.memory_space<vmem>>, vector<1x16x128xf32>,
    %90 = vector.extract_strided_slice %4 {offsets = [14, 0], sizes = [2, 128], strides = [1, 1]} : vector<16x128xf32> to vector<2x128xf32>
    %c0_41 = arith.constant 0 : index
    %c0_42 = arith.constant 0 : index
    %91 = vector.load %arg12[%c0_41, %c0_42] : memref<2x128xf32, #tpu.memory_space<vmem>>, vector<2x128xf32>
    tpu.vector_store %arg12[%c0_41, %c0_42], %90 {strides = array<i32>} : memref<2x128xf32, #tpu.memory_space<vmem>>, vector<2x128xf32>,
    %92 = vector.extract_strided_slice %46 {offsets = [12, 0], sizes = [4, 128], strides = [1, 1]} : vector<16x128xf32> to vector<4x128xf32>
    %c0_43 = arith.constant 0 : index
    %c0_44 = arith.constant 0 : index
    %93 = vector.load %arg13[%c0_43, %c0_44] : memref<4x128xf32, #tpu.memory_space<vmem>>, vector<4x128xf32>
    tpu.vector_store %arg13[%c0_43, %c0_44], %92 {strides = array<i32>} : memref<4x128xf32, #tpu.memory_space<vmem>>, vector<4x128xf32>,
    return
  }
  func.func @transform_0(%arg0: i32, %arg1: i32) -> (i32, i32, i32) {
    %c0_i32 = arith.constant 0 : i32
    %c0_i32_0 = arith.constant 0 : i32
    return %arg0, %arg1, %c0_i32 : i32, i32, i32
  }
  func.func @transform_1(%arg0: i32, %arg1: i32) -> (i32, i32) {
    %c0_i32 = arith.constant 0 : i32
    %c0_i32_0 = arith.constant 0 : i32
    %c0_i32_1 = arith.constant 0 : i32
    return %c0_i32, %c0_i32_0 : i32, i32
  }
  func.func @transform_2(%arg0: i32, %arg1: i32) -> (i32, i32) {
    %c0_i32 = arith.constant 0 : i32
    %c0_i32_0 = arith.constant 0 : i32
    %c0_i32_1 = arith.constant 0 : i32
    return %c0_i32, %c0_i32_0 : i32, i32
  }
  func.func @transform_3(%arg0: i32, %arg1: i32) -> (i32, i32) {
    %c0_i32 = arith.constant 0 : i32
    %c0_i32_0 = arith.constant 0 : i32
    %c0_i32_1 = arith.constant 0 : i32
    return %c0_i32, %c0_i32_0 : i32, i32
  }
  func.func @transform_4(%arg0: i32, %arg1: i32) -> (i32, i32) {
    %c0_i32 = arith.constant 0 : i32
    %c0_i32_0 = arith.constant 0 : i32
    %c0_i32_1 = arith.constant 0 : i32
    return %c0_i32, %c0_i32_0 : i32, i32
  }
  func.func @transform_5(%arg0: i32, %arg1: i32) -> (i32, i32) {
    %c0_i32 = arith.constant 0 : i32
    %c0_i32_0 = arith.constant 0 : i32
    %c0_i32_1 = arith.constant 0 : i32
    return %c0_i32, %c0_i32_0 : i32, i32
  }
  func.func @transform_6(%arg0: i32, %arg1: i32) -> (i32, i32) {
    %c0_i32 = arith.constant 0 : i32
    %c0_i32_0 = arith.constant 0 : i32
    %c0_i32_1 = arith.constant 0 : i32
    return %c0_i32, %c0_i32_0 : i32, i32
  }
  func.func @transform_7(%arg0: i32, %arg1: i32) -> (i32, i32) {
    %c0_i32 = arith.constant 0 : i32
    %c0_i32_0 = arith.constant 0 : i32
    %c0_i32_1 = arith.constant 0 : i32
    return %c0_i32, %c0_i32_0 : i32, i32
  }
  func.func @transform_8(%arg0: i32, %arg1: i32) -> (i32, i32) {
    %c0_i32 = arith.constant 0 : i32
    %c0_i32_0 = arith.constant 0 : i32
    %c0_i32_1 = arith.constant 0 : i32
    return %c0_i32, %c0_i32_0 : i32, i32
  }
  func.func @transform_9(%arg0: i32, %arg1: i32) -> (i32, i32, i32) {
    %c0_i32 = arith.constant 0 : i32
    %c0_i32_0 = arith.constant 0 : i32
    return %arg0, %arg1, %c0_i32 : i32, i32, i32
  }
}

</mosaic_0001>

<bundles_post_ra>
// kernel: tpu_custom_call.1
= control target key start
LH: loop header
LB: loop body
LE: loop exit
PB: predicated region body
PF: predicated region fallthrough
CT: control target
= control target key end

     0   :  { %s1951_s0 = inlined_call_operand.hbm [shape: f32[2,32,128], index: 0, kind: input, shape index: {}]   ;;  %s1952_s1 = inlined_call_operand.hbm [shape: f32[384,128], index: 1, kind: input, shape index: {}]   ;;  %s1953_s2 = inlined_call_operand.vmem [shape: f32[1,128], index: 2, kind: input, shape index: {}]   ;;  %s1954_s3 = inlined_call_operand.vmem [shape: f32[1,128], index: 3, kind: input, shape index: {}]   ;;  %s1955_s4 = inlined_call_operand.vmem [shape: f32[1,128], index: 4, kind: input, shape index: {}]   ;;  %s1956_s5 = inlined_call_operand.hbm [shape: f32[384,128], index: 5, kind: input, shape index: {}]   ;;  %s1957_s6 = inlined_call_operand.vmem [shape: f32[1,128], index: 6, kind: input, shape index: {}]   ;;  %s1958_s7 = inlined_call_operand.vmem [shape: f32[1,128], index: 7, kind: input, shape index: {}]   ;;  %s1959_s8 = inlined_call_operand.vmem [shape: f32[1,128], index: 8, kind: input, shape index: {}]   ;;  %s1960_s9 = inlined_call_operand.hbm [shape: f32[2,32,128], index: 9, kind: output, shape index: {}]  }
   0x1   :  { %1970 = sst [smem:[#allocation19_spill]] %s1952_s1 }
   0x2   :  { %1971 = sst [smem:[#allocation20_spill]] %s1955_s4 }
   0x3   :  { %1972 = sst [smem:[#allocation21_spill]] %s1956_s5 }
   0x4   :  { %1973 = sst [smem:[#allocation22_spill]] %s1957_s6 }
   0x5   :  { %1974 = sst [smem:[#allocation23_spill]] %s1958_s7 }
   0x6   :  { %1975 = sst [smem:[#allocation24_spill]] %s1959_s8 }
   0x7   :  { %1976 = sst [smem:[#allocation25_spill]] %s1960_s9 }
   0x8   :  { %14 = vsyncpa [#allocation5], 0 }
   0x9   :  { %16 = vsyncpa [#allocation5 + $0x1], 0 }
   0xa   :  { %17 = vsyncpa [#allocation8], 0 }
   0xb   :  { %18 = vsyncpa [#allocation6], 0 }
   0xc   :  { %20 = vsyncpa [#allocation6 + $0x1], 0  ;;  %s1657_s30 = smov 0   ;;  %s1659_s10 = smov 0  }
   0xd   :  { %s1661_s11 = smov 0   ;;  %s1663_s12 = smov 0  }
   0xe   :  { %s1665_s13 = smov 0   ;;  %s1667_s14 = smov 0  }
   0xf   :  { %s1669_s15 = smov 0   ;;  %s1671_s16 = smov 0  }
  0x10 LB: > { %1977 = sst [smem:[#allocation14_spill]] %s1568_s30  ;;  %s1094_s17 = sadd.s32 4294967295, %s1596_s16   ;;  %s1596_s16 = sphi %s1671_s16, %s26_s16   ;;  %s1592_s15 = sphi %s1669_s15, %s2014_s15   ;;  %s1588_s14 = sphi %s1667_s14, %s2013_s14   ;;  %s1584_s13 = sphi %s1665_s13, %s2012_s13   ;;  %s1580_s12 = sphi %s1663_s12, %s2011_s12   ;;  %s1576_s11 = sphi %s1661_s11, %s2010_s11   ;;  %s1572_s10 = sphi %s1659_s10, %s2009_s10   ;;  %s1568_s30 = sphi %s1657_s30, %s2008_s30  }
  0x11   : > { %1978 = sst [smem:[#allocation15_spill]] %s1584_s13  ;;  %s1095_s18 = sadd.s32 4294967294, %s1596_s16  }
  0x12   : > { %p60_p0 = scmp.ne.s32.totalorder %s1572_s10, %s1568_s30  ;;  %p1701_p1 = scmp.eq.s32.totalorder %s1094_s17, 0 }
  0x13   : > { %p1705_p2 = scmp.eq.s32.totalorder %s1094_s17, 3  ;;  %p260_p3 = scmp.eq.s32.totalorder %s1095_s18, 3 }
  0x14   : > { %p1711_p4 = por %p1701_p1, %p60_p0  ;;  %p1096_p5 = scmp.ge.s32.totalorder %s1596_s16, 1 }
  0x15   : > { %p1716_p6 = por %p260_p3, %p60_p0  ;;  %p267_p7 = scmp.lt.s32.totalorder %s1596_s16, 5 }
  0x16   : > { %s1598_s24 = smov [#allocation7]   ;;  %s1599_s27 = smov [#allocation9]  }
  0x17   : > { %s1982_s22 = scalar_select %p1716_p6, 1, 0 }
  0x18   : > { %p1721_p8 = pnand %p1096_p5, %p267_p7  ;;  %s279_s25 = sshll.u32 %s1598_s24, 4  ;;  %s280_s25 = int_to_ptr.vmem [resolvable:$true] %s279_s25 }
  0x19   : > { %1983 = sst [smem:[#allocation16_spill]] %s1982_s22  ;;  %s301_s28 = sshll.u32 %s1599_s27, 4  ;;  %s302_s28 = int_to_ptr.vmem [resolvable:$true] %s301_s28 }
  0x1a   : > { %p1316_p9 = pneg %p1721_p8  ;;  %s1427_s29 = scalar_lea.vmem %s280_s25, 6144 }
  0x1b   : > { %p1428_p12 = scmp.ne.s32.totalorder %s280_s25, %s1427_s29  ;;  %p1435_p3 = scmp.lt.s32.totalorder %s280_s25, %s280_s25 }
  0x1c   : > { %p1729_p10 = pnand %p1316_p9, %p1701_p1  ;;  %p1436_p5 = scmp.lt.s32.totalorder %s1427_s29, %s1427_s29 }
  0x1e   : > { %p1418_p11 = pneg %p1729_p10  ;;  %p1437_p7 = por %p1436_p5, %p1435_p3 }
  0x20   : > { %p1430_p13 = pnand %p1428_p12, %p1418_p11 }
  0x22   : > { %p1431_p0 = pneg %p1430_p13 }
  0x24   : > { %p1438_p9 = pnand %p1437_p7, %p1431_p0 }
  0x26   : > { %1441 = shalt.err (!%p1438_p9)
}
  0x27   : > { %s1963_s17 = smov 128   ;;  %s1964_s18 = smov 8  }
  0x28   : > { %s1986_s1 = sld [smem:[#allocation19_spill]]  ;;  %s1453_s22 = scalar_lea.vmem %s302_s28, 6144 }
  0x29   : > { %p1454_p12 = scmp.ne.s32.totalorder %s302_s28, %s1453_s22  ;;  %p1461_p0 = scmp.lt.s32.totalorder %s302_s28, %s302_s28 }
  0x2a   : > { %p1462_p5 = scmp.lt.s32.totalorder %s1453_s22, %s1453_s22 }
  0x2b   : > { %p1456_p13 = pnand %p1454_p12, %p1418_p11 }
  0x2c   : > { %p1463_p7 = por %p1462_p5, %p1461_p0 }
  0x2d   : > { %p1457_p3 = pneg %p1456_p13 }
  0x2e   : > { %1319 = dma.hbm_to_vmem [thread:$0]  (!%p1729_p10), %s1986_s1, 6144, %s280_s25, [#allocation8], %s1963_s17, %s1963_s17, %s1964_s18  }
  0x2f   : > { %p1464_p9 = pnand %p1463_p7, %p1457_p3 }
  0x31   : > { %1467 = shalt.err (!%p1464_p9)
}
  0x32   : > { %s1987_s5 = sld [smem:[#allocation21_spill]]  ;;  %s35_s22 = sadd.s32 1, %s1588_s14 }
  0x33   : > { %s38_s25 = sadd.s32 1, %s1592_s15  ;;  %p36_p11 = scmp.ge.s32.totalorder %s35_s22, 2 }
  0x34   : > { %s47_s26 = sadd.s32 1, %s1576_s11  ;;  %p54_p12 = scmp.ne.s32.totalorder %s1576_s11, %s1572_s10 }
  0x35   : > { %p55_p13 = scmp.eq.s32.totalorder %s1596_s16, 0  ;;  %s2016_s22 = smov (%p36_p11, %s35_s22), 0 }
  0x36   : > { %1988 = sst [smem:[#allocation17_spill]] %s2016_s22  ;;  %s2018_s25 = smov (!%p36_p11, %s38_s25), %s1592_s15 }
  0x37   : > { %s43_s30 = ssub.s32 %s1588_s14, %s2016_s22  ;;  %p1768_p3 = por %p55_p13, %p54_p12 }
  0x38   : > { %1322 = dma.hbm_to_vmem [thread:$0]  (!%p1729_p10), %s1987_s5, 6144, %s302_s28, [#allocation8], %s1963_s17, %s1963_s17, %s1964_s18  }
  0x39   : > { %p40_p10 = scmp.ge.s32.totalorder %s2018_s25, 2  ;;  %p1774_p0 = por %p1705_p2, %p54_p12 }
  0x3a   : > { %p1333_p5 = scmp.lt.s32.totalorder %s1596_s16, 4  ;;  %s324_s27 = sand.u32 1, %s1576_s11  }
  0x3b   : > { %s1990_s28 = scalar_select %p1774_p0, 1, 0 }
  0x3c   : > { %s2020_s25 = smov (%p40_p10, %s2018_s25), 0  ;;  %s1100_s29 = sshll.u32 %s324_s27, 4 }
  0x3d   : > { %1991 = sst [smem:[#allocation18_spill]] %s1990_s28  ;;  %s42_s17 = ssub.s32 %s1592_s15, %s2020_s25 }
  0x3e   : > { %s44_s18 = sor.u32 %s43_s30, %s42_s17  ;;  %s1101_s1 = sshll.u32 %s1588_s14, 1 }
  0x3f   : > { %p45_p7 = scmp.eq.s32.totalorder %s44_s18, 0  ;;  %s1102_s5 = sshll.u32 %s1592_s15, 2 }
  0x40   : > { %s334_s22 = sadd.s32 %s1102_s5, %s1101_s1  ;;  %s328_s9 = scalar_lea.vmem [#allocation4], %s1100_s29 }
  0x41   : > { %s337_s20 = sshll.u32 %s328_s9, 4  ;;  %s1103_s7 = sshll.u32 %s334_s22, 7  ;;  %s338_s20 = int_to_ptr.vmem [resolvable:$true] %s337_s20 }
  0x42   : > { %s1787_s8 = scalar_select %p45_p7, %s1576_s11, %s47_s26  }
  0x43   : > { %s336_s6 = scalar_lea.hbm %s1951_s0, %s1103_s7  ;;  %p1796_p2 = pnand %p1333_p5, %p1768_p3 }
  0x44   : > { %s325_s17 = scalar_lea.sflag [#allocation5], %s324_s27  ;;  %s1481_s1 = scalar_lea.vmem %s338_s20, 256 }
  0x45   : > { %p1470_p9 = pneg %p1796_p2  ;;  %p1482_p11 = scmp.ne.s32.totalorder %s338_s20, %s1481_s1 }
  0x46   : > { %s1602_s5 = smov [#allocation4]  }
  0x47   : > { %p1484_p12 = pnand %p1482_p11, %p1470_p9  ;;  %s1486_s9 = sshll.u32 %s1602_s5, 4  ;;  %s1487_s9 = int_to_ptr.vmem [resolvable:$false] %s1486_s9 }
  0x48   : > { %s1488_s18 = scalar_lea.vmem %s1487_s9, 512  ;;  %p1489_p10 = scmp.lt.s32.totalorder %s338_s20, %s1487_s9 }
  0x49   : > { %p1485_p13 = pneg %p1484_p12  ;;  %p1490_p7 = scmp.lt.s32.totalorder %s1488_s18, %s1481_s1 }
  0x4b   : > { %p1491_p6 = por %p1490_p7, %p1489_p10 }
  0x4d   : > { %p1492_p0 = pnand %p1491_p6, %p1485_p13 }
  0x4f   : > { %1495 = shalt.err (!%p1492_p0)
}
  0x50   : > { %s1993_s7 = smov 8   ;;  %s1994_s13 = smov 128  }
  0x51   : > { %1326 = dma.hbm_to_vmem [thread:$0]  (!%p1796_p2), %s336_s6, 256, %s338_s20, %s325_s17, %s1994_s13, %s1994_s13, %s1993_s7  }
  0x52   : > { %349 = sbr.rel (%p1721_p8) target bundleno = 1183 (0x49f), region = 56  ;;  %s1810_s22 = sand.u32 (!%p1721_p8), 1, %s1572_s10  }
  0x53   : > { %s1105_s26 = sshll.u32 (!%p1721_p8), %s1810_s22, 4  ;;  %s352_s30 = scalar_lea.sflag (!%p1721_p8), [#allocation5], %s1810_s22 }
  0x54   : > { %s1814_s24 = scalar_lea.vmem (!%p1721_p8), [#allocation4], %s1105_s26 }
  0x57   : > { %1555 = dma.done.wait (%p1711_p4), %s352_s30, 256  }
  0x58   : > { %1557 = vsyncadd (%p1711_p4), %s352_s30, 4294967040 }
  0x59   : > { %1559 = dma.done.wait (%p1701_p1), [#allocation8], 12288  }
  0x5a   : > { %1561 = vsyncadd (%p1701_p1), [#allocation8], 4294955008  ;;  %s1824_s4 = scalar_lea.vmem [#allocation10], %s1105_s26  ;;  %p1109_p6 = scmp.ne.s32.totalorder %s1580_s12, 0 }
  0x5c   : > { %403 = sbr.rel (%p1109_p6) target bundleno = 99 (0x63), region = 72 }
  0x61   : > { %v1603_v0 = vmov 0.0  }
  0x62   : > { %404 = vst [vmem:[#allocation2] sm:$0x3] %v1603_v0  ;;  %405 = vst [vmem:[#allocation3] sm:$0xf] %v1603_v0 }
  0x63 PF: > { %v469_v1 = vld [vmem:[#allocation7 + $0xf8] sm:$0xff]  ;;  %v468_v3 = vld [vmem:[#allocation7 + $0xf0] sm:$0xff]  ;;  %v467_v6 = vld [vmem:[#allocation7 + $0xe8] sm:$0xff]  ;;  %vm414_vm0 = vcmask 1041408   ;;  %vm422_vm1 = vcmask 1046528   ;;  %vm430_vm2 = vcmask 1045504  }
  0x64   : > { %v453_v2 = vld [vmem:[#allocation7 + $0x78] sm:$0xff]  ;;  %1122 = vmatprep.subr.mxu0 %v469_v1  ;;  %v452_v5 = vld [vmem:[#allocation7 + $0x70] sm:$0xff]  ;;  %v451_v8 = vld [vmem:[#allocation7 + $0x68] sm:$0xff]  ;;  %s1995_s29 = sld [smem:[#allocation20_spill]]  ;;  %vm692_vm4 = vcmask 1043456   ;;  %s985_s28 = sshll.u32 %s1824_s4, 4  ;;  %s1896_s28 = int_to_ptr.vmem [resolvable:$true] %s985_s28 }
  0x65   : > { %v485_v4 = vld [vmem:[#allocation7 + $0x178] sm:$0xff]  ;;  %1123 = vmatpush3.msra.mxu0 %v453_v2  ;;  %v484_v7 = vld [vmem:[#allocation7 + $0x170] sm:$0xff]  ;;  %v483_v9 = vld [vmem:[#allocation7 + $0x168] sm:$0xff]  ;;  %s1996_s1 = sld [smem:[#allocation22_spill]]  ;;  %s1604_s9 = smov [#allocation10]  }
  0x66   : > { %1234 = vmatprep.subr.mxu1 %v485_v4  ;;  %1124 = vmatprep.subr.mxu0 %v468_v3  ;;  %v466_v10 = vld [vmem:[#allocation7 + $0xe0] sm:$0xff]  ;;  %v465_v13 = vld [vmem:[#allocation7 + $0xd8] sm:$0xff]  ;;  %v464_v16 = vld [vmem:[#allocation7 + $0xd0] sm:$0xff]  ;;  %s1997_s5 = sld [smem:[#allocation15_spill]]  ;;  %s1500_s18 = sshll.u32 %s1604_s9, 4  ;;  %s1501_s18 = int_to_ptr.vmem [resolvable:$false] %s1500_s18 }
  0x67   : > { %1235 = vmatpush3.msra.mxu1 %v485_v4  ;;  %1125 = vmatpush3.msra.mxu0 %v452_v5  ;;  %v450_v11 = vld [vmem:[#allocation7 + $0x60] sm:$0xff]  ;;  %v449_v14 = vld [vmem:[#allocation7 + $0x58] sm:$0xff]  ;;  %v448_v17 = vld [vmem:[#allocation7 + $0x50] sm:$0xff]  ;;  %s1998_s7 = sld [smem:[#allocation23_spill]]  ;;  %p1503_p0 = scmp.lt.s32.totalorder %s1896_s28, %s1501_s18 }
  0x68   : > { %1236 = vmatprep.subr.mxu1 %v484_v7  ;;  %1126 = vmatprep.subr.mxu0 %v467_v6  ;;  %v482_v12 = vld [vmem:[#allocation7 + $0x160] sm:$0xff]  ;;  %v481_v15 = vld [vmem:[#allocation7 + $0x158] sm:$0xff]  ;;  %v480_v18 = vld [vmem:[#allocation7 + $0x150] sm:$0xff]  ;;  %s1999_s30 = sld [smem:[#allocation24_spill]] }
  0x69   : > { %1237 = vmatpush3.msra.mxu1 %v484_v7  ;;  %1127 = vmatpush3.msra.mxu0 %v451_v8  ;;  %v463_v19 = vld [vmem:[#allocation7 + $0xc8] sm:$0xff]  ;;  %v462_v22 = vld [vmem:[#allocation7 + $0xc0] sm:$0xff]  ;;  %v461_v25 = vld [vmem:[#allocation7 + $0xb8] sm:$0xff]  ;;  %s2000_s21 = sld [smem:[#allocation18_spill]] }
  0x6a   : > { %1238 = vmatprep.subr.mxu1 %v483_v9  ;;  %1128 = vmatprep.subr.mxu0 %v466_v10  ;;  %v447_v20 = vld [vmem:[#allocation7 + $0x48] sm:$0xff]  ;;  %v446_v23 = vld [vmem:[#allocation7 + $0x40] sm:$0xff]  ;;  %v445_v26 = vld [vmem:[#allocation7 + $0x38] sm:$0xff] }
  0x6b   : > { %1239 = vmatpush3.msra.mxu1 %v483_v9  ;;  %1129 = vmatpush3.msra.mxu0 %v450_v11  ;;  %v479_v21 = vld [vmem:[#allocation7 + $0x148] sm:$0xff]  ;;  %v478_v24 = vld [vmem:[#allocation7 + $0x140] sm:$0xff]  ;;  %v477_v27 = vld [vmem:[#allocation7 + $0x138] sm:$0xff] }
  0x6c   : > { %1240 = vmatprep.subr.mxu1 %v482_v12  ;;  %1130 = vmatprep.subr.mxu0 %v465_v13  ;;  %v1828_v28 = vld [vmem:[%s1814_s24] sm:$0xff]  ;;  %v1831_v30 = vld [vmem:[%s1814_s24 + $0x8] sm:$0xff]  ;;  %s1117_s24 = sshll.u32 %s1580_s12, 1  ;;  %s1118_s6 = sshll.u32 %s1997_s5, 2 }
  0x6d   : > { %1241 = vmatpush3.msra.mxu1 %v482_v12  ;;  %1131 = vmatpush3.msra.mxu0 %v449_v14  ;;  %v460_v29 = vld [vmem:[#allocation7 + $0xb0] sm:$0xff]  ;;  %v411_v31 = vld [vmem:[#allocation2] sm:$0x3]  ;;  %v415_v34 = vrot.slane %v1828_v28, 6  ;;  %v1835_v35 = vrot.slane %v1831_v30, 6  ;;  %v459_v36 = vld [vmem:[#allocation7 + $0xa8] sm:$0xff]  ;;  %s982_s19 = sadd.s32 %s1118_s6, %s1117_s24 }
  0x6e   : > { %1242 = vmatprep.subr.mxu1 %v481_v15  ;;  %1132 = vmatprep.subr.mxu0 %v464_v16  ;;  %v444_v32 = vld [vmem:[#allocation7 + $0x30] sm:$0xff]  ;;  %967 = vst [vmem:[#allocation2 - $0x6] sm:$0xc0] %v1831_v30  ;;  %v443_v37 = vld [vmem:[#allocation7 + $0x28] sm:$0xff]  ;;  %v458_v39 = vld [vmem:[#allocation7 + $0xa0] sm:$0xff]  ;;  %s1119_s23 = sshll.u32 %s982_s19, 7 }
  0x6f   : > { %1243 = vmatpush3.msra.mxu1 %v481_v15  ;;  %1133 = vmatpush3.msra.mxu0 %v448_v17  ;;  %v476_v33 = vld [vmem:[#allocation7 + $0x130] sm:$0xff]  ;;  %v475_v38 = vld [vmem:[#allocation7 + $0x128] sm:$0xff]  ;;  %v442_v40 = vld [vmem:[#allocation7 + $0x20] sm:$0xff]  ;;  %v417_v42 = vsel %vm414_vm0, %v415_v34, %v1835_v35  ;;  %v420_v43 = vsel %vm414_vm0, %v411_v31, %v415_v34  ;;  %v434_v59 = vrot.slane %v1835_v35, 2  ;;  %v426_v60 = vrot.slane %v1835_v35, 1  ;;  %s2001_s12 = sld [smem:[#allocation25_spill]] }
  0x70   : > { %1244 = vmatprep.subr.mxu1 %v480_v18  ;;  %1134 = vmatprep.subr.mxu0 %v463_v19  ;;  %v474_v41 = vld [vmem:[#allocation7 + $0x120] sm:$0xff]  ;;  %v457_v44 = vld [vmem:[#allocation7 + $0x98] sm:$0xff]  ;;  %v456_v47 = vld [vmem:[#allocation7 + $0x90] sm:$0xff]  ;;  %v423_v48 = vrot.slane %v420_v43, 1  ;;  %v424_v49 = vrot.slane %v417_v42, 1  ;;  %v431_v55 = vrot.slane %v420_v43, 2  ;;  %v408_v15 = vlaneseq }
  0x71   : > { %1245 = vmatpush3.msra.mxu1 %v480_v18  ;;  %1135 = vmatpush3.msra.mxu0 %v447_v20  ;;  %v441_v45 = vld [vmem:[#allocation7 + $0x18] sm:$0xff]  ;;  %v440_v50 = vld [vmem:[#allocation7 + $0x10] sm:$0xff]  ;;  %v455_v52 = vld [vmem:[#allocation7 + $0x88] sm:$0xff]  ;;  %v432_v56 = vrot.slane %v417_v42, 2  ;;  %s1496_s5 = scalar_lea.vmem %s1896_s28, 256  ;;  %p2003_p4 = scmp.ne.s32.totalorder %s2000_s21, 0 }
  0x72   : > { %1246 = vmatprep.subr.mxu1 %v479_v21  ;;  %1136 = vmatprep.subr.mxu0 %v462_v22  ;;  %v473_v46 = vld [vmem:[#allocation7 + $0x118] sm:$0xff]  ;;  %v472_v51 = vld [vmem:[#allocation7 + $0x110] sm:$0xff]  ;;  %v439_v53 = vld [vmem:[#allocation7 + $0x8] sm:$0xff]  ;;  %v425_v58 = vsel %vm422_vm1, %v423_v48, %v424_v49  ;;  %v427_v1 = vsel %vm422_vm1, %v424_v49, %v426_v60  ;;  %v1848_v16 = vand.u32 127, %v408_v15  ;;  %p1497_p1 = scmp.ne.s32.totalorder %s1896_s28, %s1496_s5 }
  0x73   : > { %1247 = vmatpush3.msra.mxu1 %v479_v21  ;;  %1137 = vmatpush3.msra.mxu0 %v446_v23  ;;  %v471_v54 = vld [vmem:[#allocation7 + $0x108] sm:$0xff]  ;;  %v454_v57 = vld [vmem:[#allocation7 + $0x80] sm:$0xff]  ;;  %v433_v63 = vsel %vm430_vm2, %v431_v55, %v432_v56  ;;  %v435_v0 = vsel %vm430_vm2, %v432_v56, %v434_v59  ;;  %v1110_v5 = vld [vmem:[%s1953_s2] ss:$0 sm:$0xff] }
  0x74   : > { %1248 = vmatprep.subr.mxu1 %v478_v24  ;;  %1138 = vmatprep.subr.mxu0 %v461_v25  ;;  %v438_v61 = vld [vmem:[#allocation7] sm:$0xff]  ;;  %vm410_vm3 = vcmp.lt.s32.totalorder %v1848_v16, 8  ;;  %v729_v31 = vld [vmem:[#allocation9 + $0x78] sm:$0xff]  ;;  %v728_v34 = vld [vmem:[#allocation9 + $0x70] sm:$0xff]  ;;  %p1498_p8 = pnand %p1497_p1, %p2003_p4 }
  0x75   : > { %1249 = vmatpush3.msra.mxu1 %v478_v24  ;;  %1139 = vmatpush3.msra.mxu0 %v445_v26  ;;  %v470_v62 = vld [vmem:[#allocation7 + $0x100] sm:$0xff]  ;;  %v743_v35 = vld [vmem:[#allocation9 + $0xe8] sm:$0xff]  ;;  %v721_v55 = vld [vmem:[#allocation9 + $0x38] sm:$0xff]  ;;  %s2002_s20 = smov %s2001_s12  ;;  %s1894_s17 = scalar_lea.hbm %s2001_s12, %s1119_s23 }
  0x76   : > { %1250 = vmatprep.subr.mxu1 %v477_v27  ;;  %1140 = vmatprep.subr.mxu0 %v460_v29  ;;  %v761_v29 = vld [vmem:[#allocation9 + $0x178] sm:$0xff]  ;;  %v755_v48 = vld [vmem:[#allocation9 + $0x148] sm:$0xff]  ;;  %v736_v56 = vld [vmem:[#allocation9 + $0xb0] sm:$0xff]  ;;  %p1499_p3 = pneg %p1498_p8 }
  0x77   : > { %1251 = vmatpush3.msra.mxu1 %v477_v27  ;;  %1141 = vmatpush3.msra.mxu0 %v444_v32  ;;  %v745_v27 = vld [vmem:[#allocation9 + $0xf8] sm:$0xff]  ;;  %v744_v32 = vld [vmem:[#allocation9 + $0xf0] sm:$0xff]  ;;  %v723_v49 = vld [vmem:[#allocation9 + $0x48] sm:$0xff] }
  0x78   : > { %1252 = vmatprep.subr.mxu1 %v476_v33  ;;  %1142 = vmatprep.subr.mxu0 %v459_v36  ;;  %v759_v36 = vld [vmem:[#allocation9 + $0x168] sm:$0xff] }
  0x79   : > { %1253 = vmatpush3.msra.mxu1 %v476_v33  ;;  %1143 = vmatpush3.msra.mxu0 %v443_v37  ;;  %v760_v33 = vld [vmem:[#allocation9 + $0x170] sm:$0xff]  ;;  %v727_v37 = vld [vmem:[#allocation9 + $0x68] sm:$0xff] }
  0x7a   : > { %1254 = vmatprep.subr.mxu1 %v475_v38  ;;  %1144 = vmatprep.subr.mxu0 %v458_v39  ;;  %v758_v39 = vld [vmem:[#allocation9 + $0x160] sm:$0xff]  ;;  %v735_v59 = vld [vmem:[#allocation9 + $0xa8] sm:$0xff] }
  0x7b   : > { %1255 = vmatpush3.msra.mxu1 %v475_v38  ;;  %1145 = vmatpush3.msra.mxu0 %v442_v40  ;;  %v742_v38 = vld [vmem:[#allocation9 + $0xe0] sm:$0xff]  ;;  %v751_v60 = vld [vmem:[#allocation9 + $0x128] sm:$0xff] }
  0x7c   : > { %1256 = vmatprep.subr.mxu1 %v474_v41  ;;  %1146 = vmatprep.subr.mxu0 %v457_v44  ;;  %v726_v40 = vld [vmem:[#allocation9 + $0x60] sm:$0xff]  ;;  %v740_v44 = vld [vmem:[#allocation9 + $0xd0] sm:$0xff] }
  0x7d   : > { %1257 = vmatpush3.msra.mxu1 %v474_v41  ;;  %1147 = vmatpush3.msra.mxu0 %v441_v45  ;;  %v741_v41 = vld [vmem:[#allocation9 + $0xd8] sm:$0xff]  ;;  %v756_v45 = vld [vmem:[#allocation9 + $0x150] sm:$0xff] }
  0x7e   : > { %1258 = vmatprep.subr.mxu1 %v473_v46  ;;  %1148 = vmatprep.subr.mxu0 %v456_v47  ;;  %v739_v47 = vld [vmem:[#allocation9 + $0xc8] sm:$0xff] }
  0x7f   : > { %1259 = vmatpush3.msra.mxu1 %v473_v46  ;;  %1149 = vmatpush3.msra.mxu0 %v440_v50  ;;  %v724_v46 = vld [vmem:[#allocation9 + $0x50] sm:$0xff]  ;;  %v738_v50 = vld [vmem:[#allocation9 + $0xc0] sm:$0xff] }
  0x80   : > { %1260 = vmatprep.subr.mxu1 %v472_v51  ;;  %1150 = vmatprep.subr.mxu0 %v455_v52  ;;  %v722_v52 = vld [vmem:[#allocation9 + $0x40] sm:$0xff] }
  0x81   : > { %1261 = vmatpush3.msra.mxu1 %v472_v51  ;;  %1151 = vmatpush3.msra.mxu0 %v439_v53  ;;  %v754_v51 = vld [vmem:[#allocation9 + $0x140] sm:$0xff]  ;;  %v737_v53 = vld [vmem:[#allocation9 + $0xb8] sm:$0xff] }
  0x82   : > { %1262 = vmatprep.subr.mxu1 %v471_v54  ;;  %1152 = vmatprep.subr.mxu0 %v454_v57  ;;  %v752_v57 = vld [vmem:[#allocation9 + $0x130] sm:$0xff] }
  0x83   : > { %557 = vmatprep.mubr.f32.mxu0 %v425_v58  ;;  %1153 = vmatpush3.msra.mxu0 %v438_v61  ;;  %v720_v58 = vld [vmem:[#allocation9 + $0x30] sm:$0xff]  ;;  %v719_v61 = vld [vmem:[#allocation9 + $0x28] sm:$0xff] }
  0x84   : > { %1263 = vmatpush3.msra.mxu1 %v471_v54  ;;  %558 = vmatmul.mubr.f32.vlgmr.msra.gmra.mxu0 %v420_v43  ;;  %v725_v43 = vld [vmem:[#allocation9 + $0x58] sm:$0xff] }
  0x85   : > { %1264 = vmatprep.subr.mxu1 %v470_v62  ;;  %1266 = vmatprep.mubr.f32.mxu1 %v433_v63  ;;  %v753_v54 = vld [vmem:[#allocation9 + $0x138] sm:$0xff]  ;;  %v750_v63 = vld [vmem:[#allocation9 + $0x120] sm:$0xff] }
  0x86   : > { %1265 = vmatpush3.msra.mxu1 %v470_v62  ;;  %562 = vmatprep.mubr.f32.mxu0 %v427_v1  ;;  %v734_v62 = vld [vmem:[#allocation9 + $0xa0] sm:$0xff]  ;;  %v733_v1 = vld [vmem:[#allocation9 + $0x98] sm:$0xff] }
  0x87   : > { %1267 = vmatmul.mubr.f32.vlgmr.msra.gmra.mxu1 %v435_v0  ;;  %1178 = vmatprep.subr.mxu0 %v745_v27  ;;  %v718_v0 = vld [vmem:[#allocation9 + $0x20] sm:$0xff] }
  0x88   : > { %563 = vmatmul.mubr.f32.gmra.mxu0 %v417_v42  ;;  %1269 = vmatprep.subr.mxu1 %v761_v29  ;;  %v757_v42 = vld [vmem:[#allocation9 + $0x158] sm:$0xff] }
  0x89   : > { %1179 = vmatpush3.msra.mxu0 %v729_v31  ;;  %1270 = vmatpush3.msra.mxu1 %v761_v29 }
  0x8a   : > { %1180 = vmatprep.subr.mxu0 %v744_v32  ;;  %1271 = vmatprep.subr.mxu1 %v760_v33 }
  0x8b   : > { %1181 = vmatpush3.msra.mxu0 %v728_v34  ;;  %1272 = vmatpush3.msra.mxu1 %v760_v33 }
  0x8c   : > { %1182 = vmatprep.subr.mxu0 %v743_v35  ;;  %1273 = vmatprep.subr.mxu1 %v759_v36  ;;  %v689_v35 = vld [vmem:[#allocation3] sm:$0xf] }
  0x8d   : > { %1183 = vmatpush3.msra.mxu0 %v727_v37  ;;  %1274 = vmatpush3.msra.mxu1 %v759_v36 }
  0x8e   : > { %1184 = vmatprep.subr.mxu0 %v742_v38  ;;  %1275 = vmatprep.subr.mxu1 %v758_v39 }
  0x8f   : > { %1185 = vmatpush3.msra.mxu0 %v726_v40  ;;  %1276 = vmatpush3.msra.mxu1 %v758_v39 }
  0x90   : > { %1186 = vmatprep.subr.mxu0 %v741_v41  ;;  %1277 = vmatprep.subr.mxu1 %v757_v42 }
  0x91   : > { %1187 = vmatpush3.msra.mxu0 %v725_v43  ;;  %1278 = vmatpush3.msra.mxu1 %v757_v42 }
  0x92   : > { %1188 = vmatprep.subr.mxu0 %v740_v44  ;;  %1279 = vmatprep.subr.mxu1 %v756_v45 }
  0x93   : > { %1189 = vmatpush3.msra.mxu0 %v724_v46  ;;  %1280 = vmatpush3.msra.mxu1 %v756_v45 }
  0x94   : > { %1190 = vmatprep.subr.mxu0 %v739_v47  ;;  %1281 = vmatprep.subr.mxu1 %v755_v48 }
  0x95   : > { %1191 = vmatpush3.msra.mxu0 %v723_v49  ;;  %1282 = vmatpush3.msra.mxu1 %v755_v48 }
  0x96   : > { %1192 = vmatprep.subr.mxu0 %v738_v50  ;;  %1283 = vmatprep.subr.mxu1 %v754_v51 }
  0x97   : > { %1193 = vmatpush3.msra.mxu0 %v722_v52  ;;  %1284 = vmatpush3.msra.mxu1 %v754_v51  ;;  %v1113_v52 = vld [vmem:[%s1996_s1] ss:$0 sm:$0xff]  ;;  %s970_s1 = scalar_lea.sflag [#allocation6], %s1810_s22 }
  0x98   : > { %1194 = vmatprep.subr.mxu0 %v737_v53  ;;  %1285 = vmatprep.subr.mxu1 %v753_v54 }
  0x99   : > { %1195 = vmatpush3.msra.mxu0 %v721_v55  ;;  %1286 = vmatpush3.msra.mxu1 %v753_v54 }
  0x9a   : > { %1196 = vmatprep.subr.mxu0 %v736_v56  ;;  %1287 = vmatprep.subr.mxu1 %v752_v57 }
  0x9b   : > { %1197 = vmatpush3.msra.mxu0 %v720_v58  ;;  %1288 = vmatpush3.msra.mxu1 %v752_v57 }
  0x9c   : > { %1198 = vmatprep.subr.mxu0 %v735_v59  ;;  %1289 = vmatprep.subr.mxu1 %v751_v60 }
  0x9d   : > { %1199 = vmatpush3.msra.mxu0 %v719_v61  ;;  %1290 = vmatpush3.msra.mxu1 %v751_v60 }
  0x9e   : > { %1200 = vmatprep.subr.mxu0 %v734_v62  ;;  %1291 = vmatprep.subr.mxu1 %v750_v63 }
  0x9f   : > { %1201 = vmatpush3.msra.mxu0 %v718_v0  ;;  %1292 = vmatpush3.msra.mxu1 %v750_v63 }
  0xa0   : > { %1202 = vmatprep.subr.mxu0 %v733_v1 }
 0x144   : > { %v1154_v2 = vpop.f32.mrf.mxu0 }
 0x146   : > { %v1155_v3 = vpop.f32.mrf.mxu0 }
 0x147   : > { %v1268_v4 = vpop.f32.mrf.mxu1  ;;  %v1156_v6 = vadd.f32 %v1155_v3, %v1154_v2  ;;  %v749_v2 = vld [vmem:[#allocation9 + $0x118] sm:$0xff] }
 0x148   : > { %v1157_v7 = vpop.f32.mrf.mxu0  ;;  %v717_v3 = vld [vmem:[#allocation9 + $0x18] sm:$0xff]  ;;  %1293 = vmatprep.subr.mxu1 %v749_v2 }
 0x149   : > { %v560_v8 = vadd.f32 %v1156_v6, %v1110_v5  ;;  %v634_v9 = vpop.f32.mrf.mxu1  ;;  %v716_v6 = vld [vmem:[#allocation9 + $0x10] sm:$0xff]  ;;  %1203 = vmatpush3.msra.mxu0 %v717_v3  ;;  %1294 = vmatpush3.msra.mxu1 %v749_v2 }
 0x14a   : > { %v1158_v10 = vpop.f32.mrf.mxu0 }
 0x14b   : > { %v635_v11 = vadd.f32 %v634_v9, %v560_v8  ;;  %v1159_v12 = vadd.f32 %v1158_v10, %v1157_v7  ;;  %v731_v7 = vld [vmem:[#allocation9 + $0x88] sm:$0xff]  ;;  %v730_v10 = vld [vmem:[#allocation9 + $0x80] sm:$0xff] }
 0x14c   : > { %v747_v8 = vld [vmem:[#allocation9 + $0x108] sm:$0xff] }
 0x14d   : > { %v565_v13 = vadd.f32 %v1159_v12, %v1110_v5  ;;  %643 = vadd.xlane.f32.xlu0 %v635_v11  ;;  %v748_v5 = vld [vmem:[#allocation9 + $0x110] sm:$0xff]  ;;  %v715_v9 = vld [vmem:[#allocation9 + $0x8] sm:$0xff]  ;;  %v714_v12 = vld [vmem:[#allocation9] sm:$0xff] }
 0x14e   : > { %1295 = vmatprep.subr.mxu1 %v748_v5 }
 0x14f   : > { %v640_v14 = vadd.f32 %v1268_v4, %v565_v13  ;;  %v732_v4 = vld [vmem:[#allocation9 + $0x90] sm:$0xff]  ;;  %1296 = vmatpush3.msra.mxu1 %v748_v5 }
 0x150   : > { %1204 = vmatprep.subr.mxu0 %v732_v4  ;;  %1297 = vmatprep.subr.mxu1 %v747_v8 }
 0x151   : > { %645 = vadd.xlane.f32.xlu0 %v640_v14  ;;  %1205 = vmatpush3.msra.mxu0 %v716_v6 }
 0x152   : > { %1206 = vmatprep.subr.mxu0 %v731_v7  ;;  %1298 = vmatpush3.msra.mxu1 %v747_v8 }
 0x153   : > { %1207 = vmatpush3.msra.mxu0 %v715_v9 }
 0x154   : > { %1208 = vmatprep.subr.mxu0 %v730_v10 }
 0x155   : > { %1209 = vmatpush3.msra.mxu0 %v714_v12 }
 0x1d6   : > { %v644_v17 = vpop.xlane.xlu0 %643 }
 0x1d7   : > { %v647_v18 = vmul.f32 0.125, %v644_v17 }
 0x1d9   : > { %v649_v19 = vsub.f32 %v635_v11, %v647_v18  ;;  %v746_v11 = vld [vmem:[#allocation9 + $0x100] sm:$0xff] }
 0x1da   : > { %v646_v20 = vpop.xlane.xlu0 %645  ;;  %1299 = vmatprep.subr.mxu1 %v746_v11 }
 0x1db   : > { %v648_v21 = vmul.f32 0.125, %v646_v20  ;;  %v1853_v22 = vsel %vm410_vm3, %v649_v19, 0.0  ;;  %1300 = vmatpush3.msra.mxu1 %v746_v11 }
 0x1dc   : > { %v655_v23 = vmul.f32 %v1853_v22, %v1853_v22 }
 0x1dd   : > { %v650_v24 = vsub.f32 %v640_v14, %v648_v21  ;;  %v1111_v21 = vld [vmem:[%s1954_s3] ss:$0 sm:$0xff] }
 0x1de   : > { %657 = vadd.xlane.f32.xlu1 %v655_v23 }
 0x1df   : > { %v1859_v25 = vsel %vm410_vm3, %v650_v24, 0.0  ;;  %v1112_v24 = vld [vmem:[%s1995_s29] ss:$0 sm:$0xff] }
 0x1e0   : > { %v656_v26 = vmul.f32 %v1859_v25, %v1859_v25 }
 0x1e2   : > { %659 = vadd.xlane.f32.xlu1 %v656_v26 }
 0x267   : > { %v658_v13 = vpop.xlane.xlu1 %657 }
 0x268   : > { %v661_v14 = vmul.f32 0.125, %v658_v13 }
 0x26a   : > { %v663_v15 = vadd.f32 1e-08, %v661_v14 }
 0x26b   : > { %v660_v17 = vpop.xlane.xlu1 %659 }
 0x26c   : > { %1408 = vrsqrt.f32 %v663_v15  ;;  %v662_v18 = vmul.f32 0.125, %v660_v17  ;;  %v1114_v15 = vld [vmem:[%s1998_s7] ss:$0 sm:$0xff]  ;;  %s1502_s7 = scalar_lea.vmem %s1501_s18, 512 }
 0x26d   : > { %v1115_v17 = vld [vmem:[%s1999_s30] ss:$0 sm:$0xff]  ;;  %p1504_p5 = scmp.lt.s32.totalorder %s1502_s7, %s1496_s5 }
 0x26e   : > { %v664_v19 = vadd.f32 1e-08, %v662_v18 }
 0x26f   : > { %p1505_p2 = por %p1504_p5, %p1503_p0 }
 0x270   : > { %1410 = vrsqrt.f32 %v664_v19 }
 0x271   : > { %p1506_p9 = pnand %p1505_p2, %p1499_p3 }
 0x279   : > { %v1409_v20 = vpop.eup %1408 }
 0x27a   : > { %v667_v23 = vmul.f32 %v1409_v20, %v1853_v22 }
 0x27c   : > { %v676_v26 = vmul.f32 %v1111_v21, %v667_v23 }
 0x27d   : > { %v1411_v27 = vpop.eup %1410 }
 0x27e   : > { %v668_v29 = vmul.f32 %v1411_v27, %v1859_v25  ;;  %v685_v31 = vadd.f32 %v1112_v24, %v676_v26 }
 0x280   : > { %v677_v32 = vmul.f32 %v1111_v21, %v668_v29  ;;  %v687_v33 = vmax.f32 %v685_v31, 0.0 }
 0x282   : > { %v686_v34 = vadd.f32 %v1112_v24, %v677_v32  ;;  %v693_v36 = vrot.slane %v687_v33, 4 }
 0x284   : > { %v688_v37 = vmax.f32 %v686_v34, 0.0  ;;  %v698_v38 = vsel %vm692_vm4, %v689_v35, %v693_v36 }
 0x285   : > { %v700_v40 = vrot.slane %v698_v38, 2  ;;  %v707_v43 = vrot.slane %v698_v38, 4 }
 0x286   : > { %v694_v39 = vrot.slane %v688_v37, 4  ;;  %968 = vst [vmem:[#allocation3 - $0x4] sm:$0xf0] %v688_v37 }
 0x288   : > { %v695_v22 = vsel %vm692_vm4, %v693_v36, %v694_v39  ;;  %v710_v41 = vrot.slane %v694_v39, 4  ;;  %v703_v45 = vrot.slane %v694_v39, 2 }
 0x289   : > { %v701_v42 = vrot.slane %v695_v22, 2  ;;  %v708_v44 = vrot.slane %v695_v22, 4 }
 0x28b   : > { %v702_v25 = vsel %vm430_vm2, %v700_v40, %v701_v42  ;;  %v709_v46 = vsel %vm692_vm4, %v707_v43, %v708_v44  ;;  %v711_v47 = vsel %vm692_vm4, %v708_v44, %v710_v41  ;;  %v704_v48 = vsel %vm430_vm2, %v701_v42, %v703_v45 }
 0x28c   : > { %833 = vmatprep.mubr.f32.mxu0 %v702_v25  ;;  %1301 = vmatprep.mubr.f32.mxu1 %v709_v46 }
 0x28d   : > { %834 = vmatmul.mubr.f32.vlgmr.msra.gmra.mxu0 %v698_v38  ;;  %1302 = vmatmul.mubr.f32.vlgmr.msra.gmra.mxu1 %v711_v47 }
 0x28e   : > { %838 = vmatprep.mubr.f32.mxu0 %v704_v48 }
 0x291   : > { %839 = vmatmul.mubr.f32.gmra.mxu0 %v695_v22 }
 0x34d   : > { %v1210_v49 = vpop.f32.mrf.mxu0  ;;  %v1303_v50 = vpop.f32.mrf.mxu1 }
 0x34f   : > { %v1211_v51 = vpop.f32.mrf.mxu0  ;;  %v910_v56 = vpop.f32.mrf.mxu1 }
 0x350   : > { %v1212_v53 = vadd.f32 %v1211_v51, %v1210_v49 }
 0x351   : > { %v1213_v54 = vpop.f32.mrf.mxu0 }
 0x352   : > { %v836_v55 = vadd.f32 %v1212_v53, %v1113_v52 }
 0x353   : > { %v1214_v57 = vpop.f32.mrf.mxu0 }
 0x354   : > { %v911_v58 = vadd.f32 %v910_v56, %v836_v55  ;;  %v1215_v59 = vadd.f32 %v1214_v57, %v1213_v54 }
 0x356   : > { %v841_v60 = vadd.f32 %v1215_v59, %v1113_v52  ;;  %919 = vadd.xlane.f32.xlu0 %v911_v58 }
 0x358   : > { %v916_v61 = vadd.f32 %v1303_v50, %v841_v60 }
 0x35a   : > { %921 = vadd.xlane.f32.xlu1 %v916_v61 }
 0x3df   : > { %v920_v62 = vpop.xlane.xlu0 %919 }
 0x3e0   : > { %v923_v63 = vmul.f32 0.125, %v920_v62 }
 0x3e2   : > { %v925_v0 = vsub.f32 %v911_v58, %v923_v63 }
 0x3e3   : > { %v922_v1 = vpop.xlane.xlu1 %921 }
 0x3e4   : > { %v924_v2 = vmul.f32 0.125, %v922_v1  ;;  %v927_v3 = vsel %vm410_vm3, %v925_v0, 0.0 }
 0x3e5   : > { %v929_v4 = vmul.f32 %v927_v3, %v927_v3 }
 0x3e6   : > { %v926_v5 = vsub.f32 %v916_v61, %v924_v2 }
 0x3e7   : > { %931 = vadd.xlane.f32.xlu0 %v929_v4 }
 0x3e8   : > { %v928_v6 = vsel %vm410_vm3, %v926_v5, 0.0 }
 0x3e9   : > { %v930_v7 = vmul.f32 %v928_v6, %v928_v6 }
 0x3eb   : > { %933 = vadd.xlane.f32.xlu1 %v930_v7 }
 0x470   : > { %v932_v8 = vpop.xlane.xlu0 %931 }
 0x471   : > { %v935_v9 = vmul.f32 0.125, %v932_v8 }
 0x473   : > { %v937_v10 = vadd.f32 1e-08, %v935_v9 }
 0x474   : > { %v934_v11 = vpop.xlane.xlu1 %933 }
 0x475   : > { %1412 = vrsqrt.f32 %v937_v10  ;;  %v936_v12 = vmul.f32 0.125, %v934_v11 }
 0x477   : > { %v938_v13 = vadd.f32 1e-08, %v936_v12 }
 0x479   : > { %1414 = vrsqrt.f32 %v938_v13 }
 0x482   : > { %v1413_v14 = vpop.eup %1412 }
 0x483   : > { %v941_v16 = vmul.f32 %v1413_v14, %v927_v3 }
 0x485   : > { %v950_v18 = vmul.f32 %v1114_v15, %v941_v16 }
 0x486   : > { %v1415_v19 = vpop.eup %1414 }
 0x487   : > { %v942_v20 = vmul.f32 %v1415_v19, %v928_v6  ;;  %v959_v21 = vadd.f32 %v1115_v17, %v950_v18 }
 0x489   : > { %v951_v23 = vmul.f32 %v1114_v15, %v942_v20  ;;  %v961_v24 = vmax.f32 %v959_v21, 0.0 }
 0x48b   : > { %v960_v26 = vadd.f32 %v1115_v17, %v951_v23  ;;  %v963_v27 = vadd.f32 %v961_v24, %v1828_v28 }
 0x48d   : > { %v962_v29 = vmax.f32 %v960_v26, 0.0  ;;  %965 = vst [vmem:[%s1824_s4] sm:$0xff] %v963_v27 }
 0x48f   : > { %v964_v31 = vadd.f32 %v962_v29, %v1831_v30 }
 0x491   : > { %966 = vst [vmem:[%s1824_s4 + $0x8] sm:$0xff] %v964_v31 }
 0x492   : > { %1509 = shalt.err (!%p1506_p9)
}
 0x493   : > { %s1510_s4 = scalar_lea.hbm %s1894_s17, 256  ;;  %s1514_s30 = scalar_lea.hbm %s2002_s20, 1024 }
 0x494   : > { %p1511_p11 = scmp.ne.s32.totalorder %s1894_s17, %s1510_s4  ;;  %p1515_p10 = scmp.lt.s32.totalorder %s1894_s17, %s2002_s20 }
 0x495   : > { %p1516_p7 = scmp.lt.s32.totalorder %s1514_s30, %s1510_s4 }
 0x496   : > { %p1512_p12 = pnand %p1511_p11, %p2003_p4 }
 0x497   : > { %p1517_p6 = por %p1516_p7, %p1515_p10 }
 0x498   : > { %p1513_p13 = pneg %p1512_p12 }
 0x49a   : > { %p1518_p1 = pnand %p1517_p6, %p1513_p13 }
 0x49c   : > { %1521 = shalt.err (!%p1518_p1)
}
 0x49d   : > { %s1605_s19 = smov 128   ;;  %s1606_s23 = smov 8  }
 0x49e   : > { %1314 = dma.vmem_to_hbm [thread:$0]  (%p2003_p4), %s1896_s28, 256, %s1894_s17, %s970_s1, %s1605_s19, %s1605_s19, %s1606_s23  }
 0x49f PF: > { %s2004_s27 = sld [smem:[#allocation14_spill]]  ;;  %p1336_p8 = scmp.ge.s32.totalorder %s1596_s16, 2 }
 0x4a0   : > { %s2005_s29 = sld [smem:[#allocation16_spill]] }
 0x4a5   : > { %s1000_s12 = sand.u32 1, %s2004_s27  }
 0x4a6   : > { %p2006_p3 = scmp.ne.s32.totalorder %s2005_s29, 0  ;;  %s1001_s5 = scalar_lea.sflag [#allocation6], %s1000_s12 }
 0x4a8   : > { %p1328_p0 = pnand %p1336_p8, %p2006_p3 }
 0x4aa   : > { %p1329_p5 = pneg %p1328_p0 }
 0x4ac   : > { %1563 = dma.done.wait (%p1329_p5), %s1001_s5, 256  }
 0x4ad   : > { %1565 = vsyncadd (%p1329_p5), %s1001_s5, 4294967040  ;;  %s26_s16 = sadd.s32 1, %s1596_s16   ;;  %s2007_s22 = sld [smem:[#allocation17_spill]] }
 0x4ae   : > { %p23_p2 = scmp.ge.s32.totalorder %s26_s16, 6   ;;  %s2008_s30 = smov %s1572_s10 }
 0x4af   : > { %s2009_s10 = smov %s1576_s11  ;;  %s2010_s11 = smov %s1787_s8 }
 0x4b0   : > { %s2011_s12 = smov %s1588_s14  ;;  %s2012_s13 = smov %s1592_s15 }
 0x4b1   : > { %s2014_s15 = smov %s2020_s25  ;;  %25 = sbr.rel (!%p23_p2) target bundleno = 16 (0x10), region = 113 }
 0x4b3   : > { %s2013_s14 = smov %s2007_s22 }
 0x4b6   :  { %1006 = vsyncpa [#allocation5], 1 }
 0x4b7   :  { %1008 = vsyncpa [#allocation5 + $0x1], 1 }
 0x4b8   :  { %1009 = vsyncpa [#allocation8], 1 }
 0x4b9   :  { %1010 = vsyncpa [#allocation6], 1 }
 0x4ba   :  { %1012 = vsyncpa [#allocation6 + $0x1], 1 }

</bundles_post_ra>
